<compile_context>
chip_gen: v5e
topology: v5e:2x2
jax: 0.10.0
libtpu: 0.0.40
codegen_flags: <defaults>
</compile_context>

<pallas_src>
import numpy as np

import jax
import jax.numpy as jnp
from jax.experimental import pallas as pl
from jax.experimental.pallas import tpu as pltpu


# ------------------------------------------------------------------------
# One-time (init) lowering of ConvTranspose2d to an exact dense matmul on the
# NCHW-flattened feature map.
# ------------------------------------------------------------------------
def convtranspose2d_as_matmul(weight, bias, hin, win, stride, padding, output_padding):
    """weight: np.ndarray (Cin, Cout, kh, kw) in PyTorch ConvTranspose2d layout.

    Returns (M, b_full, (Cout, Hout, Wout)) such that for an NCHW-flattened
    input row x_flat (length Cin*Hin*Win):
        y_flat = x_flat @ M + b_full
    equals the NCHW-flattened output of torch.nn.ConvTranspose2d.
    """
    cin, cout, kh, kw = weight.shape
    hout = (hin - 1) * stride - 2 * padding + kh + output_padding
    wout = (win - 1) * stride - 2 * padding + kw + output_padding
    m = np.zeros((cin, hin, win, cout, hout, wout), dtype=np.float32)
    for ih in range(hin):
        for iw in range(win):
            for i in range(kh):
                for j in range(kw):
                    oh = ih * stride - padding + i
                    ow = iw * stride - padding + j
                    if 0 <= oh < hout and 0 <= ow < wout:
                        m[:, ih, iw, :, oh, ow] = weight[:, :, i, j]
    m = m.reshape(cin * hin * win, cout * hout * wout)
    b_full = np.broadcast_to(
        bias.astype(np.float32)[:, None, None], (cout, hout, wout)
    ).reshape(-1).copy()
    return m, b_full, (cout, hout, wout)


# ------------------------------------------------------------------------
# Fused Pallas kernel: chained matmuls + bias, ReLU between deconv layers,
# sigmoid at the end.  Everything lives in VMEM (single block, grid=(1,)).
# ------------------------------------------------------------------------
def make_fused_decoder_kernel(num_matmuls):
    def kernel(*refs):
        z_ref = refs[0]
        out_ref = refs[-1]
        h = z_ref[...]
        for li in range(num_matmuls):
            w_ref = refs[1 + 2 * li]
            b_ref = refs[2 + 2 * li]
            h = jnp.dot(h, w_ref[...], preferred_element_type=jnp.float32) + b_ref[...]
            # ReLU only between deconv layers (matmul 0 is the fc: no activation;
            # the last matmul feeds the sigmoid).
            if 0 < li < num_matmuls - 1:
                h = jnp.maximum(h, 0.0)
        out_ref[...] = (1.0 / (1.0 + jnp.exp(-h))).astype(out_ref.dtype)

    return kernel


def decoder_forward(mats, latent):
    """mats: list of (W, b) with W: (K_i, N_i), b: (1, N_i); latent: (B, latent_dim)."""
    B = latent.shape[0]
    operands = [latent]
    in_specs = [pl.BlockSpec(latent.shape, lambda i: (0, 0))]
    for (w, b) in mats:
        operands += [w, b]
        in_specs += [
            pl.BlockSpec(w.shape, lambda i: (0, 0)),
            pl.BlockSpec(b.shape, lambda i: (0, 0)),
        ]
    n_out = mats[-1][0].shape[1]
    kernel = make_fused_decoder_kernel(len(mats))
    return pl.pallas_call(
        kernel,
        out_shape=jax.ShapeDtypeStruct((B, n_out), latent.dtype),
        grid=(1,),
        in_specs=in_specs,
        out_specs=pl.BlockSpec((B, n_out), lambda i: (0, 0)),
        compiler_params=pltpu.CompilerParams(dimension_semantics=("arbitrary",)),
    )(*operands)


# ------------------------------------------------------------------------
# Decoder parameters (mirrors the PyTorch module's construction).
# ------------------------------------------------------------------------
def init_decoder_params(key, conv_output_shape, channels, kernel_sizes, strides,
                        paddings, latent_dim, output_channels=1):
    c0, h0, w0 = conv_output_shape
    flattened = c0 * h0 * w0

    key, k1, k2 = jax.random.split(key, 3)
    s = 1.0 / np.sqrt(latent_dim)
    wfc = jax.random.uniform(k1, (latent_dim, flattened), jnp.float32, -s, s)
    bfc = jax.random.uniform(k2, (flattened,), jnp.float32, -s, s)

    rev_ch = channels[::-1]
    rev_k = kernel_sizes[::-1]
    rev_s = strides[::-1]
    rev_p = paddings[::-1]
    n = len(rev_k)

    deconv = []
    in_ch = c0
    h, w = h0, w0
    for i in range(n):
        out_ch = rev_ch[i + 1] if i < n - 1 else output_channels
        k_sz, st, pd = rev_k[i], rev_s[i], rev_p[i]
        op = max(st - 1, 0)
        key, kk1, kk2 = jax.random.split(key, 3)
        fan_in = out_ch * k_sz * k_sz
        sc = 1.0 / np.sqrt(fan_in)
        wgt = jax.random.uniform(kk1, (in_ch, out_ch, k_sz, k_sz), jnp.float32, -sc, sc)
        b = jax.random.uniform(kk2, (out_ch,), jnp.float32, -sc, sc)
        deconv.append(dict(weight=wgt, bias=b, stride=st, padding=pd,
                           output_padding=op, hin=h, win=w, k=k_sz))
        h = (h - 1) * st - 2 * pd + k_sz + op
        w = (w - 1) * st - 2 * pd + k_sz + op
        in_ch = out_ch

    return dict(wfc=wfc, bfc=bfc, deconv=deconv,
                conv_output_shape=conv_output_shape, out_shape=(in_ch, h, w))


def build_fused_operands(params):
    """Turn (fc, deconv layers) into a list of lane-dense (W, b) matmul operands."""
    mats = [(params["wfc"], params["bfc"].reshape(1, -1))]
    for layer in params["deconv"]:
        m, b_full, _ = convtranspose2d_as_matmul(
            np.asarray(layer["weight"]), np.asarray(layer["bias"]),
            layer["hin"], layer["win"], layer["stride"], layer["padding"],
            layer["output_padding"])
        mats.append((jnp.asarray(m), jnp.asarray(b_full).reshape(1, -1)))
    return mats


# ------------------------------------------------------------------------
# Pure-JAX reference (lax.conv_general_dilated) for correctness checking.
# ------------------------------------------------------------------------
def decoder_forward_reference(params, latent):
    x = latent @ params["wfc"] + params["bfc"]
    B = latent.shape[0]
    c0, h0, w0 = params["conv_output_shape"]
    x = x.reshape(B, c0, h0, w0)
    n = len(params["deconv"])
    for i, layer in enumerate(params["deconv"]):
        w = layer["weight"]  # (Cin, Cout, k, k)
        k, st, pd, op = layer["k"], layer["stride"], layer["padding"], layer["output_padding"]
        w_conv = jnp.flip(jnp.transpose(w, (1, 0, 2, 3)), axis=(2, 3))  # (Cout, Cin, k, k)
        lo = k - 1 - pd
        hi = k - 1 - pd + op
        x = jax.lax.conv_general_dilated(
            x, w_conv,
            window_strides=(1, 1),
            padding=((lo, hi), (lo, hi)),
            lhs_dilation=(st, st),
            dimension_numbers=("NCHW", "OIHW", "NCHW"),
            precision=jax.lax.Precision.HIGHEST,
        )
        x = x + layer["bias"].reshape(1, -1, 1, 1)
        if i < n - 1:
            x = jnp.maximum(x, 0.0)
    return jax.nn.sigmoid(x)


if __name__ == "__main__":
    # Config mirroring an encoder with input (1,16,16), channels [8,16], k=3, s=2, p=1:
    #   conv_output_shape = (16, 4, 4) -> flattened 256, latent_dim = 32,
    #   decoder reconstructs a (1, 16, 16) image. batch = 2.
    conv_output_shape = (16, 4, 4)
    channels = [8, 16]
    kernel_sizes = [3, 3]
    strides = [2, 2]
    paddings = [1, 1]
    latent_dim = 32
    output_channels = 1
    batch = 2

    key = jax.random.PRNGKey(0)
    key, pkey, zkey = jax.random.split(key, 3)
    params = init_decoder_params(pkey, conv_output_shape, channels, kernel_sizes,
                                 strides, paddings, latent_dim, output_channels)
    mats = build_fused_operands(params)

    latent = jax.random.normal(zkey, (batch, latent_dim), dtype=jnp.float32)

    out_flat = decoder_forward(mats, latent)              # (B, Cout*Hout*Wout), lane-dense
    c_out, h_out, w_out = params["out_shape"]
    out = out_flat.reshape(batch, c_out, h_out, w_out)    # NCHW, free row-major reshape
    out = jax.block_until_ready(out)
    assert out.shape == (batch, output_channels, 16, 16), out.shape

    ref = jax.block_until_ready(decoder_forward_reference(params, latent))
    max_err = float(jnp.max(jnp.abs(out - ref)))
    assert jnp.allclose(out, ref, atol=1e-2, rtol=1e-2), max_err

    print("KERNEL_OK")
</pallas_src>

<mosaic_0001>
module attributes {stable_mosaic.version = 11 : i64} {
  func.func @kernel(%arg0: i32, %arg1: memref<2x32xf32, #tpu.memory_space<vmem>>, %arg2: memref<32x256xf32, #tpu.memory_space<vmem>>, %arg3: memref<1x256xf32, #tpu.memory_space<vmem>>, %arg4: memref<256x512xf32, #tpu.memory_space<vmem>>, %arg5: memref<1x512xf32, #tpu.memory_space<vmem>>, %arg6: memref<512x256xf32, #tpu.memory_space<vmem>>, %arg7: memref<1x256xf32, #tpu.memory_space<vmem>>, %arg8: memref<2x256xf32, #tpu.memory_space<vmem>>) attributes {dimension_semantics = [#tpu.dimension_semantics<arbitrary>], iteration_bounds = array<i64: 1>, scalar_prefetch = 0 : i64, scratch_operands = 0 : i64, tpu.core_type = #tpu.core_type<tc>, window_params = [{pipeline_mode = #tpu.pipeline_mode<synchronous>, transform_indices = @transform_0, window_bounds = array<i64: 2, 32>}, {pipeline_mode = #tpu.pipeline_mode<synchronous>, transform_indices = @transform_1, window_bounds = array<i64: 32, 256>}, {pipeline_mode = #tpu.pipeline_mode<synchronous>, transform_indices = @transform_2, window_bounds = array<i64: 1, 256>}, {pipeline_mode = #tpu.pipeline_mode<synchronous>, transform_indices = @transform_3, window_bounds = array<i64: 256, 512>}, {pipeline_mode = #tpu.pipeline_mode<synchronous>, transform_indices = @transform_4, window_bounds = array<i64: 1, 512>}, {pipeline_mode = #tpu.pipeline_mode<synchronous>, transform_indices = @transform_5, window_bounds = array<i64: 512, 256>}, {pipeline_mode = #tpu.pipeline_mode<synchronous>, transform_indices = @transform_6, window_bounds = array<i64: 1, 256>}, {pipeline_mode = #tpu.pipeline_mode<synchronous>, transform_indices = @transform_7, window_bounds = array<i64: 2, 256>}]} {
    %c0 = arith.constant 0 : index
    %c0_0 = arith.constant 0 : index
    %0 = vector.load %arg1[%c0, %c0_0] : memref<2x32xf32, #tpu.memory_space<vmem>>, vector<2x32xf32>
    %c0_1 = arith.constant 0 : index
    %c0_2 = arith.constant 0 : index
    %1 = vector.load %arg2[%c0_1, %c0_2] : memref<32x256xf32, #tpu.memory_space<vmem>>, vector<32x256xf32>
    %cst = arith.constant dense<0.000000e+00> : vector<2x256xf32>
    %2 = tpu.matmul %0, %1, %cst {dimension_numbers = #tpu.dot_dimension_numbers<[1], [0], [0], [1], [0, 0, 1, 1], [], []>} : vector<2x32xf32>, vector<32x256xf32>, vector<2x256xf32> -> vector<2x256xf32>
    %c0_3 = arith.constant 0 : index
    %c0_4 = arith.constant 0 : index
    %3 = vector.load %arg3[%c0_3, %c0_4] : memref<1x256xf32, #tpu.memory_space<vmem>>, vector<1x256xf32>
    %4 = vector.broadcast %3 : vector<1x256xf32> to vector<2x256xf32>
    %5 = arith.addf %2, %4 : vector<2x256xf32>
    %c0_5 = arith.constant 0 : index
    %c0_6 = arith.constant 0 : index
    %6 = vector.load %arg4[%c0_5, %c0_6] : memref<256x512xf32, #tpu.memory_space<vmem>>, vector<256x512xf32>
    %cst_7 = arith.constant dense<0.000000e+00> : vector<2x512xf32>
    %7 = tpu.matmul %5, %6, %cst_7 {dimension_numbers = #tpu.dot_dimension_numbers<[1], [0], [0], [1], [0, 0, 1, 1], [], []>} : vector<2x256xf32>, vector<256x512xf32>, vector<2x512xf32> -> vector<2x512xf32>
    %c0_8 = arith.constant 0 : index
    %c0_9 = arith.constant 0 : index
    %8 = vector.load %arg5[%c0_8, %c0_9] : memref<1x512xf32, #tpu.memory_space<vmem>>, vector<1x512xf32>
    %9 = vector.broadcast %8 : vector<1x512xf32> to vector<2x512xf32>
    %10 = arith.addf %7, %9 : vector<2x512xf32>
    %cst_10 = arith.constant 0.000000e+00 : f32
    %11 = vector.broadcast %cst_10 : f32 to vector<2x512xf32>
    %12 = arith.maximumf %10, %11 : vector<2x512xf32>
    %c0_11 = arith.constant 0 : index
    %c0_12 = arith.constant 0 : index
    %13 = vector.load %arg6[%c0_11, %c0_12] : memref<512x256xf32, #tpu.memory_space<vmem>>, vector<512x256xf32>
    %cst_13 = arith.constant dense<0.000000e+00> : vector<2x256xf32>
    %14 = tpu.matmul %12, %13, %cst_13 {dimension_numbers = #tpu.dot_dimension_numbers<[1], [0], [0], [1], [0, 0, 1, 1], [], []>} : vector<2x512xf32>, vector<512x256xf32>, vector<2x256xf32> -> vector<2x256xf32>
    %c0_14 = arith.constant 0 : index
    %c0_15 = arith.constant 0 : index
    %15 = vector.load %arg7[%c0_14, %c0_15] : memref<1x256xf32, #tpu.memory_space<vmem>>, vector<1x256xf32>
    %16 = vector.broadcast %15 : vector<1x256xf32> to vector<2x256xf32>
    %17 = arith.addf %14, %16 : vector<2x256xf32>
    %cst_16 = arith.constant 0.000000e+00 : f32
    %18 = vector.broadcast %cst_16 : f32 to vector<2x256xf32>
    %19 = arith.subf %18, %17 : vector<2x256xf32>
    %20 = math.exp %19 : vector<2x256xf32>
    %cst_17 = arith.constant 1.000000e+00 : f32
    %21 = vector.broadcast %cst_17 : f32 to vector<2x256xf32>
    %22 = arith.addf %21, %20 : vector<2x256xf32>
    %cst_18 = arith.constant 1.000000e+00 : f32
    %23 = vector.broadcast %cst_18 : f32 to vector<2x256xf32>
    %24 = arith.divf %23, %22 : vector<2x256xf32>
    %c0_19 = arith.constant 0 : index
    %c0_20 = arith.constant 0 : index
    %25 = vector.load %arg8[%c0_19, %c0_20] : memref<2x256xf32, #tpu.memory_space<vmem>>, vector<2x256xf32>
    tpu.vector_store %arg8[%c0_19, %c0_20], %24 {strides = array<i32>} : memref<2x256xf32, #tpu.memory_space<vmem>>, vector<2x256xf32>,
    return
  }
  func.func @transform_0(%arg0: i32) -> (i32, i32) {
    %c0_i32 = arith.constant 0 : i32
    %c0_i32_0 = arith.constant 0 : i32
    %c0_i32_1 = arith.constant 0 : i32
    return %c0_i32, %c0_i32_0 : i32, i32
  }
  func.func @transform_1(%arg0: i32) -> (i32, i32) {
    %c0_i32 = arith.constant 0 : i32
    %c0_i32_0 = arith.constant 0 : i32
    %c0_i32_1 = arith.constant 0 : i32
    return %c0_i32, %c0_i32_0 : i32, i32
  }
  func.func @transform_2(%arg0: i32) -> (i32, i32) {
    %c0_i32 = arith.constant 0 : i32
    %c0_i32_0 = arith.constant 0 : i32
    %c0_i32_1 = arith.constant 0 : i32
    return %c0_i32, %c0_i32_0 : i32, i32
  }
  func.func @transform_3(%arg0: i32) -> (i32, i32) {
    %c0_i32 = arith.constant 0 : i32
    %c0_i32_0 = arith.constant 0 : i32
    %c0_i32_1 = arith.constant 0 : i32
    return %c0_i32, %c0_i32_0 : i32, i32
  }
  func.func @transform_4(%arg0: i32) -> (i32, i32) {
    %c0_i32 = arith.constant 0 : i32
    %c0_i32_0 = arith.constant 0 : i32
    %c0_i32_1 = arith.constant 0 : i32
    return %c0_i32, %c0_i32_0 : i32, i32
  }
  func.func @transform_5(%arg0: i32) -> (i32, i32) {
    %c0_i32 = arith.constant 0 : i32
    %c0_i32_0 = arith.constant 0 : i32
    %c0_i32_1 = arith.constant 0 : i32
    return %c0_i32, %c0_i32_0 : i32, i32
  }
  func.func @transform_6(%arg0: i32) -> (i32, i32) {
    %c0_i32 = arith.constant 0 : i32
    %c0_i32_0 = arith.constant 0 : i32
    %c0_i32_1 = arith.constant 0 : i32
    return %c0_i32, %c0_i32_0 : i32, i32
  }
  func.func @transform_7(%arg0: i32) -> (i32, i32) {
    %c0_i32 = arith.constant 0 : i32
    %c0_i32_0 = arith.constant 0 : i32
    %c0_i32_1 = arith.constant 0 : i32
    return %c0_i32, %c0_i32_0 : i32, i32
  }
}

</mosaic_0001>

<bundles_post_ra>
// kernel: tpu_custom_call.1
= control target key start
LH: loop header
LB: loop body
LE: loop exit
PB: predicated region body
PF: predicated region fallthrough
CT: control target
= control target key end

     0   :  { %12 = vsyncpa [#allocation3], 0  ;;  %s1121_s0 = inlined_call_operand.hbm [shape: f32[2,32], index: 0, kind: input, shape index: {}]   ;;  %s1122_s1 = inlined_call_operand.hbm [shape: f32[32,256], index: 1, kind: input, shape index: {}]   ;;  %s1123_s2 = inlined_call_operand.hbm [shape: f32[1,256], index: 2, kind: input, shape index: {}]   ;;  %s1124_s3 = inlined_call_operand.hbm [shape: f32[256,512], index: 3, kind: input, shape index: {}]   ;;  %s1125_s4 = inlined_call_operand.hbm [shape: f32[1,512], index: 4, kind: input, shape index: {}]   ;;  %s1126_s5 = inlined_call_operand.hbm [shape: f32[512,256], index: 5, kind: input, shape index: {}]   ;;  %s1127_s6 = inlined_call_operand.vmem [shape: f32[1,256], index: 6, kind: input, shape index: {}]   ;;  %s1128_s7 = inlined_call_operand.hbm [shape: f32[2,256], index: 7, kind: output, shape index: {}]  }
   0x1   :  { %13 = vsyncpa [#allocation6], 0 }
   0x2   :  { %14 = vsyncpa [#allocation9], 0 }
   0x3   :  { %15 = vsyncpa [#allocation12], 0  ;;  %s32_s26 = sshll.u32 %s1122_s1, 4  ;;  %s33_s26 = int_to_ptr.hbm [resolvable:$true] %s32_s26 }
   0x4   :  { %16 = vsyncpa [#allocation4], 0  ;;  %s1034_s27 = smov [#allocation5]   ;;  %s56_s8 = sshll.u32 %s1124_s3, 4  ;;  %s57_s8 = int_to_ptr.hbm [resolvable:$true] %s56_s8 }
   0x5   :  { %s34_s28 = sshll.u32 %s1034_s27, 4  ;;  %s1035_s9 = smov 256   ;;  %s35_s28 = int_to_ptr.vmem [resolvable:$true] %s34_s28 }
   0x6   :  { %s1036_s10 = smov 16   ;;  %s1037_s11 = smov [#allocation8]  }
   0x7   :  { %40 = dma.hbm_to_vmem [thread:$0]  %s33_s26, 1024, %s35_s28, [#allocation6], %s1035_s9, %s1035_s9, %s1036_s10  }
   0x8   :  { %s58_s12 = sshll.u32 %s1037_s11, 4  ;;  %s1038_s1 = smov 512   ;;  %s59_s12 = int_to_ptr.vmem [resolvable:$true] %s58_s12 }
   0x9   :  { %s1039_s13 = smov 32   ;;  %s22_s16 = sshll.u32 %s1121_s0, 4  ;;  %s23_s16 = int_to_ptr.hbm [resolvable:$true] %s22_s16 }
   0xa   :  { %64 = dma.hbm_to_vmem [thread:$0]  %s57_s8, 16384, %s59_s12, [#allocation9], %s1038_s1, %s1038_s1, %s1039_s13  }
   0xb   :  { %s1040_s17 = smov [#allocation2]   ;;  %s46_s20 = sshll.u32 %s1123_s2, 4  ;;  %s47_s20 = int_to_ptr.hbm [resolvable:$true] %s46_s20 }
   0xc   :  { %s24_s3 = sshll.u32 %s1040_s17, 4  ;;  %s1041_s21 = smov [#allocation7]   ;;  %s25_s3 = int_to_ptr.vmem [resolvable:$true] %s24_s3 }
   0xd   :  { %27 = dma.hbm_to_vmem [thread:$0]  %s23_s16, 32, %s25_s3, [#allocation3]  }
   0xe   :  { %s48_s22 = sshll.u32 %s1041_s21, 4  ;;  %s70_s25 = sshll.u32 %s1125_s4, 4  ;;  %s49_s22 = int_to_ptr.vmem [resolvable:$true] %s48_s22  ;;  %s71_s25 = int_to_ptr.hbm [resolvable:$true] %s70_s25 }
   0xf   :  { %51 = dma.hbm_to_vmem [thread:$0]  %s47_s20, 32, %s49_s22, [#allocation6]  }
  0x10   :  { %s80_s27 = sshll.u32 %s1126_s5, 4  ;;  %s1042_s28 = smov [#allocation10]   ;;  %s81_s27 = int_to_ptr.hbm [resolvable:$true] %s80_s27 }
  0x11   :  { %s72_s29 = sshll.u32 %s1042_s28, 4  ;;  %s1043_s2 = smov [#allocation11]   ;;  %s73_s29 = int_to_ptr.vmem [resolvable:$true] %s72_s29 }
  0x12   :  { %75 = dma.hbm_to_vmem [thread:$0]  %s71_s25, 64, %s73_s29, [#allocation9]  }
  0x13   :  { %s82_s30 = sshll.u32 %s1043_s2, 4  ;;  %s83_s30 = int_to_ptr.vmem [resolvable:$true] %s82_s30 }
  0x14   :  { %88 = dma.hbm_to_vmem [thread:$0]  %s81_s27, 16384, %s83_s30, [#allocation12], %s1035_s9, %s1035_s9, %s1036_s10  }
  0x15   :  { %1024 = dma.done.wait [#allocation3], 32  }
  0x16   :  { %1025 = vsyncadd [#allocation3], 4294967264 }
  0x17   :  { %1026 = dma.done.wait [#allocation6], 1056  }
  0x18   :  { %1027 = vsyncadd [#allocation6], 4294966240 }
  0x19   :  { %1028 = dma.done.wait [#allocation9], 16448  }
  0x1a   :  { %1029 = vsyncadd [#allocation9], 4294950848 }
  0x1b   :  { %1030 = dma.done.wait [#allocation12], 16384  }
  0x1c   :  { %1031 = vsyncadd [#allocation12], 4294950912  ;;  %v122_v0 = vld [vmem:[#allocation5 + $0x30] sm:$0xff]  ;;  %v123_v1 = vld [vmem:[#allocation5 + $0x38] sm:$0xff]  ;;  %vm130_vm0 = vcmask 261120   ;;  %s822_s11 = sshll.u32 %s1128_s7, 4  ;;  %s823_s11 = int_to_ptr.hbm [resolvable:$true] %s822_s11 }
  0x1d   :  { %v120_v2 = vld [vmem:[#allocation5 + $0x20] sm:$0xff]  ;;  %146 = vmatpush.msra.mxu0 %v122_v0  ;;  %166 = vmatpush.msra.mxu1 %v123_v1  ;;  %v121_v3 = vld [vmem:[#allocation5 + $0x28] sm:$0xff]  ;;  %v118_v4 = vld [vmem:[#allocation5 + $0x10] sm:$0xff]  ;;  %vm811_vm8 = vcmask 1041408  }
  0x1e   :  { %v119_v5 = vld [vmem:[#allocation5 + $0x18] sm:$0xff]  ;;  %v116_v6 = vld [vmem:[#allocation5] sm:$0xff]  ;;  %v117_v9 = vld [vmem:[#allocation5 + $0x8] sm:$0xff] }
  0x1f   :  { %147 = vmatpush.msra.mxu0 %v120_v2  ;;  %167 = vmatpush.msra.mxu1 %v121_v3  ;;  %v234_v7 = vld [vmem:[#allocation8 + $0x1e0] sm:$0xff]  ;;  %v115_v12 = vld [vmem:[#allocation2] sm:$0x3]  ;;  %v235_v13 = vld [vmem:[#allocation8 + $0x1e8] sm:$0xff] }
  0x20   :  { %v298_v8 = vld [vmem:[#allocation8 + $0x3e0] sm:$0xff]  ;;  %312 = vmatpush.msra.mxu2 %v234_v7  ;;  %v299_v14 = vld [vmem:[#allocation8 + $0x3e8] sm:$0xff]  ;;  %v236_v7 = vld [vmem:[#allocation8 + $0x1f0] sm:$0xff] }
  0x21   :  { %332 = vmatpush.msra.mxu3 %v298_v8  ;;  %v230_v10 = vld [vmem:[#allocation8 + $0x1c0] sm:$0xff]  ;;  %148 = vmatpush.msra.mxu0 %v118_v4  ;;  %v231_v17 = vld [vmem:[#allocation8 + $0x1c8] sm:$0xff]  ;;  %v300_v8 = vld [vmem:[#allocation8 + $0x3f0] sm:$0xff] }
  0x22   :  { %v294_v11 = vld [vmem:[#allocation8 + $0x3c0] sm:$0xff]  ;;  %168 = vmatpush.msra.mxu1 %v119_v5  ;;  %313 = vmatpush.msra.mxu2 %v230_v10  ;;  %v295_v18 = vld [vmem:[#allocation8 + $0x3c8] sm:$0xff] }
  0x23   :  { %333 = vmatpush.msra.mxu3 %v294_v11  ;;  %149 = vmatpush.msra.mxu0 %v116_v6  ;;  %v226_v15 = vld [vmem:[#allocation8 + $0x1a0] sm:$0xff]  ;;  %v227_v21 = vld [vmem:[#allocation8 + $0x1a8] sm:$0xff]  ;;  %v237_v11 = vld [vmem:[#allocation8 + $0x1f8] sm:$0xff] }
  0x24   :  { %169 = vmatpush.msra.mxu1 %v117_v9  ;;  %v290_v16 = vld [vmem:[#allocation8 + $0x3a0] sm:$0xff]  ;;  %835 = vmatmul.msk.f32.vlgmr.msra.gmra.mxu0 %vm130_vm0, %v115_v12  ;;  %v291_v22 = vld [vmem:[#allocation8 + $0x3a8] sm:$0xff] }
  0x25   :  { %836 = vmatmul.msk.f32.vlgmr.msra.gmra.mxu1 %vm130_vm0, %v115_v12  ;;  %352 = vmatpush.msrb.mxu0 %v235_v13  ;;  %v222_v19 = vld [vmem:[#allocation8 + $0x180] sm:$0xff]  ;;  %v223_v25 = vld [vmem:[#allocation8 + $0x188] sm:$0xff]  ;;  %v301_v12 = vld [vmem:[#allocation8 + $0x3f8] sm:$0xff] }
  0x26   :  { %372 = vmatpush.msrb.mxu1 %v299_v14  ;;  %v286_v20 = vld [vmem:[#allocation8 + $0x380] sm:$0xff]  ;;  %314 = vmatpush.msra.mxu2 %v226_v15  ;;  %v287_v26 = vld [vmem:[#allocation8 + $0x388] sm:$0xff]  ;;  %v232_v13 = vld [vmem:[#allocation8 + $0x1d0] sm:$0xff] }
  0x27   :  { %334 = vmatpush.msra.mxu3 %v290_v16  ;;  %353 = vmatpush.msrb.mxu0 %v231_v17  ;;  %v218_v23 = vld [vmem:[#allocation8 + $0x160] sm:$0xff]  ;;  %v219_v29 = vld [vmem:[#allocation8 + $0x168] sm:$0xff]  ;;  %v296_v14 = vld [vmem:[#allocation8 + $0x3d0] sm:$0xff] }
  0x28   :  { %373 = vmatpush.msrb.mxu1 %v295_v18  ;;  %v282_v24 = vld [vmem:[#allocation8 + $0x360] sm:$0xff]  ;;  %315 = vmatpush.msra.mxu2 %v222_v19  ;;  %v283_v30 = vld [vmem:[#allocation8 + $0x368] sm:$0xff]  ;;  %v233_v15 = vld [vmem:[#allocation8 + $0x1d8] sm:$0xff] }
  0x29   :  { %335 = vmatpush.msra.mxu3 %v286_v20  ;;  %354 = vmatpush.msrb.mxu0 %v227_v21  ;;  %v214_v27 = vld [vmem:[#allocation8 + $0x140] sm:$0xff]  ;;  %v215_v33 = vld [vmem:[#allocation8 + $0x148] sm:$0xff]  ;;  %v297_v16 = vld [vmem:[#allocation8 + $0x3d8] sm:$0xff] }
  0x2a   :  { %374 = vmatpush.msrb.mxu1 %v291_v22  ;;  %v278_v28 = vld [vmem:[#allocation8 + $0x340] sm:$0xff]  ;;  %316 = vmatpush.msra.mxu2 %v218_v23  ;;  %v279_v34 = vld [vmem:[#allocation8 + $0x348] sm:$0xff]  ;;  %v228_v17 = vld [vmem:[#allocation8 + $0x1b0] sm:$0xff] }
  0x2b   :  { %336 = vmatpush.msra.mxu3 %v282_v24  ;;  %355 = vmatpush.msrb.mxu0 %v223_v25  ;;  %v210_v31 = vld [vmem:[#allocation8 + $0x120] sm:$0xff]  ;;  %v211_v37 = vld [vmem:[#allocation8 + $0x128] sm:$0xff]  ;;  %v292_v18 = vld [vmem:[#allocation8 + $0x3b0] sm:$0xff] }
  0x2c   :  { %375 = vmatpush.msrb.mxu1 %v287_v26  ;;  %v274_v32 = vld [vmem:[#allocation8 + $0x320] sm:$0xff]  ;;  %317 = vmatpush.msra.mxu2 %v214_v27  ;;  %v275_v38 = vld [vmem:[#allocation8 + $0x328] sm:$0xff]  ;;  %v229_v19 = vld [vmem:[#allocation8 + $0x1b8] sm:$0xff] }
  0x2d   :  { %337 = vmatpush.msra.mxu3 %v278_v28  ;;  %356 = vmatpush.msrb.mxu0 %v219_v29  ;;  %v206_v35 = vld [vmem:[#allocation8 + $0x100] sm:$0xff]  ;;  %v207_v41 = vld [vmem:[#allocation8 + $0x108] sm:$0xff]  ;;  %v293_v20 = vld [vmem:[#allocation8 + $0x3b8] sm:$0xff] }
  0x2e   :  { %376 = vmatpush.msrb.mxu1 %v283_v30  ;;  %v270_v36 = vld [vmem:[#allocation8 + $0x300] sm:$0xff]  ;;  %318 = vmatpush.msra.mxu2 %v210_v31  ;;  %v271_v42 = vld [vmem:[#allocation8 + $0x308] sm:$0xff]  ;;  %v224_v21 = vld [vmem:[#allocation8 + $0x190] sm:$0xff] }
  0x2f   :  { %338 = vmatpush.msra.mxu3 %v274_v32  ;;  %357 = vmatpush.msrb.mxu0 %v215_v33  ;;  %v202_v39 = vld [vmem:[#allocation8 + $0xe0] sm:$0xff]  ;;  %v203_v45 = vld [vmem:[#allocation8 + $0xe8] sm:$0xff]  ;;  %v288_v22 = vld [vmem:[#allocation8 + $0x390] sm:$0xff] }
  0x30   :  { %377 = vmatpush.msrb.mxu1 %v279_v34  ;;  %v266_v40 = vld [vmem:[#allocation8 + $0x2e0] sm:$0xff]  ;;  %319 = vmatpush.msra.mxu2 %v206_v35  ;;  %v267_v46 = vld [vmem:[#allocation8 + $0x2e8] sm:$0xff]  ;;  %v225_v23 = vld [vmem:[#allocation8 + $0x198] sm:$0xff] }
  0x31   :  { %339 = vmatpush.msra.mxu3 %v270_v36  ;;  %358 = vmatpush.msrb.mxu0 %v211_v37  ;;  %v198_v43 = vld [vmem:[#allocation8 + $0xc0] sm:$0xff]  ;;  %v199_v49 = vld [vmem:[#allocation8 + $0xc8] sm:$0xff]  ;;  %v289_v24 = vld [vmem:[#allocation8 + $0x398] sm:$0xff] }
  0x32   :  { %378 = vmatpush.msrb.mxu1 %v275_v38  ;;  %v262_v44 = vld [vmem:[#allocation8 + $0x2c0] sm:$0xff]  ;;  %320 = vmatpush.msra.mxu2 %v202_v39  ;;  %v263_v50 = vld [vmem:[#allocation8 + $0x2c8] sm:$0xff]  ;;  %v220_v25 = vld [vmem:[#allocation8 + $0x170] sm:$0xff] }
  0x33   :  { %340 = vmatpush.msra.mxu3 %v266_v40  ;;  %359 = vmatpush.msrb.mxu0 %v207_v41  ;;  %v194_v47 = vld [vmem:[#allocation8 + $0xa0] sm:$0xff]  ;;  %v195_v53 = vld [vmem:[#allocation8 + $0xa8] sm:$0xff]  ;;  %v284_v26 = vld [vmem:[#allocation8 + $0x370] sm:$0xff] }
  0x34   :  { %379 = vmatpush.msrb.mxu1 %v271_v42  ;;  %v258_v48 = vld [vmem:[#allocation8 + $0x2a0] sm:$0xff]  ;;  %321 = vmatpush.msra.mxu2 %v198_v43  ;;  %v259_v54 = vld [vmem:[#allocation8 + $0x2a8] sm:$0xff]  ;;  %v221_v27 = vld [vmem:[#allocation8 + $0x178] sm:$0xff] }
  0x35   :  { %341 = vmatpush.msra.mxu3 %v262_v44  ;;  %360 = vmatpush.msrb.mxu0 %v203_v45  ;;  %v190_v51 = vld [vmem:[#allocation8 + $0x80] sm:$0xff]  ;;  %v191_v57 = vld [vmem:[#allocation8 + $0x88] sm:$0xff]  ;;  %v285_v28 = vld [vmem:[#allocation8 + $0x378] sm:$0xff] }
  0x36   :  { %380 = vmatpush.msrb.mxu1 %v267_v46  ;;  %v254_v52 = vld [vmem:[#allocation8 + $0x280] sm:$0xff]  ;;  %322 = vmatpush.msra.mxu2 %v194_v47  ;;  %v255_v58 = vld [vmem:[#allocation8 + $0x288] sm:$0xff]  ;;  %v216_v29 = vld [vmem:[#allocation8 + $0x150] sm:$0xff] }
  0x37   :  { %342 = vmatpush.msra.mxu3 %v258_v48  ;;  %361 = vmatpush.msrb.mxu0 %v199_v49  ;;  %v186_v55 = vld [vmem:[#allocation8 + $0x60] sm:$0xff]  ;;  %v187_v61 = vld [vmem:[#allocation8 + $0x68] sm:$0xff]  ;;  %v280_v30 = vld [vmem:[#allocation8 + $0x350] sm:$0xff] }
  0x38   :  { %381 = vmatpush.msrb.mxu1 %v263_v50  ;;  %v250_v56 = vld [vmem:[#allocation8 + $0x260] sm:$0xff]  ;;  %323 = vmatpush.msra.mxu2 %v190_v51  ;;  %v251_v62 = vld [vmem:[#allocation8 + $0x268] sm:$0xff]  ;;  %v217_v31 = vld [vmem:[#allocation8 + $0x158] sm:$0xff] }
  0x39   :  { %343 = vmatpush.msra.mxu3 %v254_v52  ;;  %362 = vmatpush.msrb.mxu0 %v195_v53  ;;  %v182_v59 = vld [vmem:[#allocation8 + $0x40] sm:$0xff]  ;;  %v183_v1 = vld [vmem:[#allocation8 + $0x48] sm:$0xff]  ;;  %v281_v32 = vld [vmem:[#allocation8 + $0x358] sm:$0xff] }
  0x3a   :  { %382 = vmatpush.msrb.mxu1 %v259_v54  ;;  %v246_v60 = vld [vmem:[#allocation8 + $0x240] sm:$0xff]  ;;  %324 = vmatpush.msra.mxu2 %v186_v55  ;;  %v247_v2 = vld [vmem:[#allocation8 + $0x248] sm:$0xff]  ;;  %v212_v33 = vld [vmem:[#allocation8 + $0x130] sm:$0xff] }
  0x3b   :  { %344 = vmatpush.msra.mxu3 %v250_v56  ;;  %363 = vmatpush.msrb.mxu0 %v191_v57  ;;  %v178_v63 = vld [vmem:[#allocation8 + $0x20] sm:$0xff]  ;;  %v179_v5 = vld [vmem:[#allocation8 + $0x28] sm:$0xff]  ;;  %v276_v34 = vld [vmem:[#allocation8 + $0x330] sm:$0xff] }
  0x3c   :  { %383 = vmatpush.msrb.mxu1 %v255_v58  ;;  %v242_v0 = vld [vmem:[#allocation8 + $0x220] sm:$0xff]  ;;  %325 = vmatpush.msra.mxu2 %v182_v59  ;;  %v243_v6 = vld [vmem:[#allocation8 + $0x228] sm:$0xff]  ;;  %v213_v35 = vld [vmem:[#allocation8 + $0x138] sm:$0xff] }
  0x3d   :  { %345 = vmatpush.msra.mxu3 %v246_v60  ;;  %364 = vmatpush.msrb.mxu0 %v187_v61  ;;  %v174_v3 = vld [vmem:[#allocation8] sm:$0xff]  ;;  %v175_v9 = vld [vmem:[#allocation8 + $0x8] sm:$0xff]  ;;  %v277_v36 = vld [vmem:[#allocation8 + $0x338] sm:$0xff] }
  0x3e   :  { %384 = vmatpush.msrb.mxu1 %v251_v62  ;;  %v238_v4 = vld [vmem:[#allocation8 + $0x200] sm:$0xff]  ;;  %326 = vmatpush.msra.mxu2 %v178_v63  ;;  %v239_v10 = vld [vmem:[#allocation8 + $0x208] sm:$0xff]  ;;  %v208_v37 = vld [vmem:[#allocation8 + $0x110] sm:$0xff] }
  0x3f   :  { %346 = vmatpush.msra.mxu3 %v242_v0  ;;  %365 = vmatpush.msrb.mxu0 %v183_v1  ;;  %v272_v38 = vld [vmem:[#allocation8 + $0x310] sm:$0xff]  ;;  %v209_v39 = vld [vmem:[#allocation8 + $0x118] sm:$0xff] }
  0x40   :  { %385 = vmatpush.msrb.mxu1 %v247_v2  ;;  %327 = vmatpush.msra.mxu2 %v174_v3  ;;  %v273_v40 = vld [vmem:[#allocation8 + $0x318] sm:$0xff]  ;;  %v204_v41 = vld [vmem:[#allocation8 + $0xf0] sm:$0xff] }
  0x41   :  { %347 = vmatpush.msra.mxu3 %v238_v4  ;;  %366 = vmatpush.msrb.mxu0 %v179_v5  ;;  %v268_v42 = vld [vmem:[#allocation8 + $0x2f0] sm:$0xff]  ;;  %v205_v43 = vld [vmem:[#allocation8 + $0xf8] sm:$0xff] }
  0x42   :  { %386 = vmatpush.msrb.mxu1 %v243_v6  ;;  %392 = vmatpush.msrb.mxu2 %v236_v7  ;;  %v269_v44 = vld [vmem:[#allocation8 + $0x2f8] sm:$0xff]  ;;  %v200_v45 = vld [vmem:[#allocation8 + $0xd0] sm:$0xff] }
  0x43   :  { %412 = vmatpush.msrb.mxu3 %v300_v8  ;;  %367 = vmatpush.msrb.mxu0 %v175_v9  ;;  %v264_v46 = vld [vmem:[#allocation8 + $0x2d0] sm:$0xff]  ;;  %v201_v47 = vld [vmem:[#allocation8 + $0xd8] sm:$0xff] }
  0x44   :  { %387 = vmatpush.msrb.mxu1 %v239_v10  ;;  %393 = vmatpush.msrb.mxu2 %v232_v13  ;;  %v265_v48 = vld [vmem:[#allocation8 + $0x2d8] sm:$0xff]  ;;  %v196_v49 = vld [vmem:[#allocation8 + $0xb0] sm:$0xff] }
  0x45   :  { %432 = vmatpush.msra.mxu0 %v237_v11  ;;  %413 = vmatpush.msrb.mxu3 %v296_v14  ;;  %v260_v50 = vld [vmem:[#allocation8 + $0x2b0] sm:$0xff]  ;;  %v197_v51 = vld [vmem:[#allocation8 + $0xb8] sm:$0xff] }
  0x46   :  { %452 = vmatpush.msra.mxu1 %v301_v12  ;;  %394 = vmatpush.msrb.mxu2 %v228_v17  ;;  %v261_v52 = vld [vmem:[#allocation8 + $0x2b8] sm:$0xff]  ;;  %v192_v53 = vld [vmem:[#allocation8 + $0x90] sm:$0xff] }
  0x47   :  { %433 = vmatpush.msra.mxu0 %v233_v15  ;;  %414 = vmatpush.msrb.mxu3 %v292_v18  ;;  %v256_v54 = vld [vmem:[#allocation8 + $0x290] sm:$0xff]  ;;  %v193_v55 = vld [vmem:[#allocation8 + $0x98] sm:$0xff] }
  0x48   :  { %453 = vmatpush.msra.mxu1 %v297_v16  ;;  %395 = vmatpush.msrb.mxu2 %v224_v21  ;;  %v257_v56 = vld [vmem:[#allocation8 + $0x298] sm:$0xff]  ;;  %v188_v57 = vld [vmem:[#allocation8 + $0x70] sm:$0xff]  ;;  %v504_v21 = vld [vmem:[#allocation11 + $0xe0] sm:$0xff] }
  0x49   :  { %434 = vmatpush.msra.mxu0 %v229_v19  ;;  %415 = vmatpush.msrb.mxu3 %v288_v22  ;;  %v252_v58 = vld [vmem:[#allocation8 + $0x270] sm:$0xff]  ;;  %v189_v59 = vld [vmem:[#allocation8 + $0x78] sm:$0xff]  ;;  %v600_v22 = vld [vmem:[#allocation11 + $0x3e0] sm:$0xff] }
  0x4a   :  { %454 = vmatpush.msra.mxu1 %v293_v20  ;;  %396 = vmatpush.msrb.mxu2 %v220_v25  ;;  %v253_v60 = vld [vmem:[#allocation8 + $0x278] sm:$0xff]  ;;  %v184_v61 = vld [vmem:[#allocation8 + $0x50] sm:$0xff]  ;;  %v536_v20 = vld [vmem:[#allocation11 + $0x1e0] sm:$0xff] }
  0x4b   :  { %435 = vmatpush.msra.mxu0 %v225_v23  ;;  %416 = vmatpush.msrb.mxu3 %v284_v26  ;;  %v248_v62 = vld [vmem:[#allocation8 + $0x250] sm:$0xff]  ;;  %v185_v63 = vld [vmem:[#allocation8 + $0x58] sm:$0xff]  ;;  %v568_v23 = vld [vmem:[#allocation11 + $0x2e0] sm:$0xff] }
  0x4c   :  { %455 = vmatpush.msra.mxu1 %v289_v24  ;;  %397 = vmatpush.msrb.mxu2 %v216_v29  ;;  %v249_v0 = vld [vmem:[#allocation8 + $0x258] sm:$0xff]  ;;  %v180_v1 = vld [vmem:[#allocation8 + $0x30] sm:$0xff]  ;;  %v500_v29 = vld [vmem:[#allocation11 + $0xc0] sm:$0xff] }
  0x4d   :  { %436 = vmatpush.msra.mxu0 %v221_v27  ;;  %417 = vmatpush.msrb.mxu3 %v280_v30  ;;  %v244_v2 = vld [vmem:[#allocation8 + $0x230] sm:$0xff]  ;;  %v181_v3 = vld [vmem:[#allocation8 + $0x38] sm:$0xff]  ;;  %v596_v30 = vld [vmem:[#allocation11 + $0x3c0] sm:$0xff] }
  0x4e   :  { %456 = vmatpush.msra.mxu1 %v285_v28  ;;  %398 = vmatpush.msrb.mxu2 %v212_v33  ;;  %v245_v4 = vld [vmem:[#allocation8 + $0x238] sm:$0xff]  ;;  %v176_v5 = vld [vmem:[#allocation8 + $0x10] sm:$0xff]  ;;  %v532_v28 = vld [vmem:[#allocation11 + $0x1c0] sm:$0xff] }
  0x4f   :  { %437 = vmatpush.msra.mxu0 %v217_v31  ;;  %418 = vmatpush.msrb.mxu3 %v276_v34  ;;  %v240_v6 = vld [vmem:[#allocation8 + $0x210] sm:$0xff]  ;;  %v177_v7 = vld [vmem:[#allocation8 + $0x18] sm:$0xff]  ;;  %v564_v31 = vld [vmem:[#allocation11 + $0x2c0] sm:$0xff] }
  0x50   :  { %457 = vmatpush.msra.mxu1 %v281_v32  ;;  %399 = vmatpush.msrb.mxu2 %v208_v37  ;;  %v241_v8 = vld [vmem:[#allocation8 + $0x218] sm:$0xff]  ;;  %v496_v37 = vld [vmem:[#allocation11 + $0xa0] sm:$0xff] }
  0x51   :  { %438 = vmatpush.msra.mxu0 %v213_v35  ;;  %419 = vmatpush.msrb.mxu3 %v272_v38  ;;  %v124_v9 = vld [vmem:[#allocation7] sm:$0x3]  ;;  %v538_v16 = vld [vmem:[#allocation11 + $0x1f0] sm:$0xff]  ;;  %v592_v38 = vld [vmem:[#allocation11 + $0x3a0] sm:$0xff] }
  0x52   :  { %458 = vmatpush.msra.mxu1 %v277_v36  ;;  %400 = vmatpush.msrb.mxu2 %v204_v41  ;;  %v126_v10 = vperm.slane %v124_v9, 0  ;;  %v127_v11 = vperm.slane %v124_v9, 1  ;;  %v506_v17 = vld [vmem:[#allocation11 + $0xf0] sm:$0xff]  ;;  %v528_v36 = vld [vmem:[#allocation11 + $0x1a0] sm:$0xff] }
  0x53   :  { %439 = vmatpush.msra.mxu0 %v209_v39  ;;  %420 = vmatpush.msrb.mxu3 %v268_v42  ;;  %v602_v18 = vld [vmem:[#allocation11 + $0x3f0] sm:$0xff]  ;;  %v560_v39 = vld [vmem:[#allocation11 + $0x2a0] sm:$0xff] }
  0x54   :  { %459 = vmatpush.msra.mxu1 %v273_v40  ;;  %401 = vmatpush.msrb.mxu2 %v200_v45  ;;  %v570_v19 = vld [vmem:[#allocation11 + $0x2f0] sm:$0xff]  ;;  %v492_v45 = vld [vmem:[#allocation11 + $0x80] sm:$0xff] }
  0x55   :  { %440 = vmatpush.msra.mxu0 %v205_v43  ;;  %421 = vmatpush.msrb.mxu3 %v264_v46  ;;  %v534_v24 = vld [vmem:[#allocation11 + $0x1d0] sm:$0xff]  ;;  %v588_v46 = vld [vmem:[#allocation11 + $0x380] sm:$0xff] }
  0x56   :  { %460 = vmatpush.msra.mxu1 %v269_v44  ;;  %402 = vmatpush.msrb.mxu2 %v196_v49  ;;  %v502_v25 = vld [vmem:[#allocation11 + $0xd0] sm:$0xff]  ;;  %v524_v44 = vld [vmem:[#allocation11 + $0x180] sm:$0xff] }
  0x57   :  { %441 = vmatpush.msra.mxu0 %v201_v47  ;;  %422 = vmatpush.msrb.mxu3 %v260_v50  ;;  %v598_v26 = vld [vmem:[#allocation11 + $0x3d0] sm:$0xff]  ;;  %v556_v47 = vld [vmem:[#allocation11 + $0x280] sm:$0xff] }
  0x58   :  { %461 = vmatpush.msra.mxu1 %v265_v48  ;;  %403 = vmatpush.msrb.mxu2 %v192_v53  ;;  %v566_v27 = vld [vmem:[#allocation11 + $0x2d0] sm:$0xff]  ;;  %v488_v53 = vld [vmem:[#allocation11 + $0x60] sm:$0xff] }
  0x59   :  { %442 = vmatpush.msra.mxu0 %v197_v51  ;;  %423 = vmatpush.msrb.mxu3 %v256_v54  ;;  %v530_v32 = vld [vmem:[#allocation11 + $0x1b0] sm:$0xff]  ;;  %v584_v54 = vld [vmem:[#allocation11 + $0x360] sm:$0xff] }
  0x5a   :  { %462 = vmatpush.msra.mxu1 %v261_v52  ;;  %404 = vmatpush.msrb.mxu2 %v188_v57  ;;  %v498_v33 = vld [vmem:[#allocation11 + $0xb0] sm:$0xff]  ;;  %v520_v52 = vld [vmem:[#allocation11 + $0x160] sm:$0xff] }
  0x5b   :  { %443 = vmatpush.msra.mxu0 %v193_v55  ;;  %424 = vmatpush.msrb.mxu3 %v252_v58  ;;  %v594_v34 = vld [vmem:[#allocation11 + $0x3b0] sm:$0xff]  ;;  %v552_v55 = vld [vmem:[#allocation11 + $0x260] sm:$0xff] }
  0x5c   :  { %463 = vmatpush.msra.mxu1 %v257_v56  ;;  %405 = vmatpush.msrb.mxu2 %v184_v61  ;;  %v562_v35 = vld [vmem:[#allocation11 + $0x2b0] sm:$0xff]  ;;  %v484_v61 = vld [vmem:[#allocation11 + $0x40] sm:$0xff] }
  0x5d   :  { %444 = vmatpush.msra.mxu0 %v189_v59  ;;  %425 = vmatpush.msrb.mxu3 %v248_v62  ;;  %v526_v40 = vld [vmem:[#allocation11 + $0x190] sm:$0xff]  ;;  %v580_v62 = vld [vmem:[#allocation11 + $0x340] sm:$0xff] }
  0x5e   :  { %464 = vmatpush.msra.mxu1 %v253_v60  ;;  %406 = vmatpush.msrb.mxu2 %v180_v1  ;;  %v494_v41 = vld [vmem:[#allocation11 + $0x90] sm:$0xff]  ;;  %v516_v60 = vld [vmem:[#allocation11 + $0x140] sm:$0xff] }
  0x5f   :  { %445 = vmatpush.msra.mxu0 %v185_v63  ;;  %426 = vmatpush.msrb.mxu3 %v244_v2  ;;  %v590_v42 = vld [vmem:[#allocation11 + $0x390] sm:$0xff]  ;;  %v548_v63 = vld [vmem:[#allocation11 + $0x240] sm:$0xff] }
  0x60   :  { %465 = vmatpush.msra.mxu1 %v249_v0  ;;  %407 = vmatpush.msrb.mxu2 %v176_v5  ;;  %v558_v43 = vld [vmem:[#allocation11 + $0x290] sm:$0xff]  ;;  %v480_v5 = vld [vmem:[#allocation11 + $0x20] sm:$0xff] }
  0x61   :  { %446 = vmatpush.msra.mxu0 %v181_v3  ;;  %427 = vmatpush.msrb.mxu3 %v240_v6  ;;  %v522_v48 = vld [vmem:[#allocation11 + $0x170] sm:$0xff]  ;;  %v576_v6 = vld [vmem:[#allocation11 + $0x320] sm:$0xff] }
  0x62   :  { %466 = vmatpush.msra.mxu1 %v245_v4  ;;  %v490_v49 = vld [vmem:[#allocation11 + $0x70] sm:$0xff]  ;;  %v512_v4 = vld [vmem:[#allocation11 + $0x120] sm:$0xff] }
  0x63   :  { %447 = vmatpush.msra.mxu0 %v177_v7  ;;  %v586_v50 = vld [vmem:[#allocation11 + $0x370] sm:$0xff]  ;;  %v544_v7 = vld [vmem:[#allocation11 + $0x220] sm:$0xff] }
  0x64   :  { %467 = vmatpush.msra.mxu1 %v241_v8  ;;  %v554_v51 = vld [vmem:[#allocation11 + $0x270] sm:$0xff] }
  0x65   :  { %v518_v56 = vld [vmem:[#allocation11 + $0x150] sm:$0xff] }
  0x66   :  { %v486_v57 = vld [vmem:[#allocation11 + $0x50] sm:$0xff] }
  0x67   :  { %v582_v58 = vld [vmem:[#allocation11 + $0x350] sm:$0xff] }
  0x68   :  { %v550_v59 = vld [vmem:[#allocation11 + $0x250] sm:$0xff] }
  0x69   :  { %v514_v0 = vld [vmem:[#allocation11 + $0x130] sm:$0xff] }
  0x6a   :  { %v482_v1 = vld [vmem:[#allocation11 + $0x30] sm:$0xff] }
  0x6b   :  { %v578_v2 = vld [vmem:[#allocation11 + $0x330] sm:$0xff] }
  0x6c   :  { %v546_v3 = vld [vmem:[#allocation11 + $0x230] sm:$0xff] }
  0x6d   :  { %v510_v8 = vld [vmem:[#allocation11 + $0x110] sm:$0xff] }
  0x6e   :  { %v478_v9 = vld [vmem:[#allocation11 + $0x10] sm:$0xff] }
  0xa1   :  { %v151_v12 = vpop.f32.mrf.mxu0 }
  0xa2   :  { %v171_v13 = vpop.f32.mrf.mxu1  ;;  %v152_v14 = vadd.f32 %v151_v12, %v126_v10  ;;  %v574_v10 = vld [vmem:[#allocation11 + $0x310] sm:$0xff]  ;;  %v508_v12 = vld [vmem:[#allocation11 + $0x100] sm:$0xff] }
  0xa3   :  { %v172_v15 = vadd.f32 %v171_v13, %v127_v11  ;;  %v542_v11 = vld [vmem:[#allocation11 + $0x210] sm:$0xff]  ;;  %v476_v13 = vld [vmem:[#allocation11] sm:$0xff] }
  0xa4   :  { %328 = vmatmul.f32.vlgmr.msra.gmra.mxu2 %v152_v14  ;;  %368 = vmatmul.f32.vlgmr.msrb.gmra.mxu0 %v152_v14 }
  0xa5   :  { %348 = vmatmul.f32.vlgmr.msra.gmra.mxu3 %v172_v15  ;;  %388 = vmatmul.f32.vlgmr.msrb.gmra.mxu1 %v172_v15 }
  0xa6   :  { %630 = vmatpush.msra.mxu3 %v538_v16  ;;  %610 = vmatpush.msra.mxu2 %v506_v17  ;;  %v572_v16 = vld [vmem:[#allocation11 + $0x300] sm:$0xff] }
  0xa7   :  { %670 = vmatpush.msrb.mxu1 %v602_v18  ;;  %650 = vmatpush.msrb.mxu0 %v570_v19  ;;  %v540_v17 = vld [vmem:[#allocation11 + $0x200] sm:$0xff]  ;;  %v537_v18 = vld [vmem:[#allocation11 + $0x1e8] sm:$0xff] }
  0xa8   :  { %631 = vmatpush.msra.mxu3 %v536_v20  ;;  %611 = vmatpush.msra.mxu2 %v504_v21  ;;  %v505_v19 = vld [vmem:[#allocation11 + $0xe8] sm:$0xff]  ;;  %v603_v20 = vld [vmem:[#allocation11 + $0x3f8] sm:$0xff] }
  0xa9   :  { %671 = vmatpush.msrb.mxu1 %v600_v22  ;;  %651 = vmatpush.msrb.mxu0 %v568_v23  ;;  %v571_v21 = vld [vmem:[#allocation11 + $0x2f8] sm:$0xff] }
  0xaa   :  { %632 = vmatpush.msra.mxu3 %v534_v24  ;;  %612 = vmatpush.msra.mxu2 %v502_v25  ;;  %v535_v22 = vld [vmem:[#allocation11 + $0x1d8] sm:$0xff]  ;;  %v601_v24 = vld [vmem:[#allocation11 + $0x3e8] sm:$0xff] }
  0xab   :  { %672 = vmatpush.msrb.mxu1 %v598_v26  ;;  %652 = vmatpush.msrb.mxu0 %v566_v27  ;;  %v503_v23 = vld [vmem:[#allocation11 + $0xd8] sm:$0xff]  ;;  %v533_v25 = vld [vmem:[#allocation11 + $0x1c8] sm:$0xff] }
  0xac   :  { %408 = vmatmul.f32.vlgmr.msrb.gmra.mxu2 %v152_v14  ;;  %448 = vmatmul.f32.vlgmr.msra.gmra.mxu0 %v152_v14  ;;  %v539_v14 = vld [vmem:[#allocation11 + $0x1f8] sm:$0xff]  ;;  %v501_v26 = vld [vmem:[#allocation11 + $0xc8] sm:$0xff] }
  0xad   :  { %428 = vmatmul.f32.vlgmr.msrb.gmra.mxu3 %v172_v15  ;;  %468 = vmatmul.f32.vlgmr.msra.gmra.mxu1 %v172_v15  ;;  %v507_v15 = vld [vmem:[#allocation11 + $0xf8] sm:$0xff] }
  0xae   :  { %633 = vmatpush.msra.mxu3 %v532_v28  ;;  %613 = vmatpush.msra.mxu2 %v500_v29  ;;  %v599_v27 = vld [vmem:[#allocation11 + $0x3d8] sm:$0xff] }
  0xaf   :  { %673 = vmatpush.msrb.mxu1 %v596_v30  ;;  %653 = vmatpush.msrb.mxu0 %v564_v31  ;;  %v531_v28 = vld [vmem:[#allocation11 + $0x1b8] sm:$0xff]  ;;  %v597_v30 = vld [vmem:[#allocation11 + $0x3c8] sm:$0xff] }
  0xb0   :  { %634 = vmatpush.msra.mxu3 %v530_v32  ;;  %614 = vmatpush.msra.mxu2 %v498_v33  ;;  %v499_v29 = vld [vmem:[#allocation11 + $0xb8] sm:$0xff]  ;;  %v529_v31 = vld [vmem:[#allocation11 + $0x1a8] sm:$0xff] }
  0xb1   :  { %674 = vmatpush.msrb.mxu1 %v594_v34  ;;  %654 = vmatpush.msrb.mxu0 %v562_v35  ;;  %v527_v32 = vld [vmem:[#allocation11 + $0x198] sm:$0xff]  ;;  %v525_v33 = vld [vmem:[#allocation11 + $0x188] sm:$0xff] }
  0xb2   :  { %635 = vmatpush.msra.mxu3 %v528_v36  ;;  %615 = vmatpush.msra.mxu2 %v496_v37  ;;  %v497_v34 = vld [vmem:[#allocation11 + $0xa8] sm:$0xff]  ;;  %v523_v35 = vld [vmem:[#allocation11 + $0x178] sm:$0xff] }
  0xb3   :  { %675 = vmatpush.msrb.mxu1 %v592_v38  ;;  %655 = vmatpush.msrb.mxu0 %v560_v39  ;;  %v569_v36 = vld [vmem:[#allocation11 + $0x2e8] sm:$0xff]  ;;  %v595_v37 = vld [vmem:[#allocation11 + $0x3b8] sm:$0xff] }
  0xb4   :  { %636 = vmatpush.msra.mxu3 %v526_v40  ;;  %616 = vmatpush.msra.mxu2 %v494_v41  ;;  %v495_v38 = vld [vmem:[#allocation11 + $0x98] sm:$0xff]  ;;  %v521_v39 = vld [vmem:[#allocation11 + $0x168] sm:$0xff] }
  0xb5   :  { %676 = vmatpush.msrb.mxu1 %v590_v42  ;;  %656 = vmatpush.msrb.mxu0 %v558_v43  ;;  %v567_v40 = vld [vmem:[#allocation11 + $0x2d8] sm:$0xff]  ;;  %v593_v41 = vld [vmem:[#allocation11 + $0x3a8] sm:$0xff] }
  0xb6   :  { %637 = vmatpush.msra.mxu3 %v524_v44  ;;  %617 = vmatpush.msra.mxu2 %v492_v45  ;;  %v493_v42 = vld [vmem:[#allocation11 + $0x88] sm:$0xff]  ;;  %v519_v43 = vld [vmem:[#allocation11 + $0x158] sm:$0xff] }
  0xb7   :  { %677 = vmatpush.msrb.mxu1 %v588_v46  ;;  %657 = vmatpush.msrb.mxu0 %v556_v47  ;;  %v565_v44 = vld [vmem:[#allocation11 + $0x2c8] sm:$0xff]  ;;  %v591_v45 = vld [vmem:[#allocation11 + $0x398] sm:$0xff] }
  0xb8   :  { %638 = vmatpush.msra.mxu3 %v522_v48  ;;  %618 = vmatpush.msra.mxu2 %v490_v49  ;;  %v491_v46 = vld [vmem:[#allocation11 + $0x78] sm:$0xff]  ;;  %v517_v47 = vld [vmem:[#allocation11 + $0x148] sm:$0xff] }
  0xb9   :  { %678 = vmatpush.msrb.mxu1 %v586_v50  ;;  %658 = vmatpush.msrb.mxu0 %v554_v51  ;;  %v563_v48 = vld [vmem:[#allocation11 + $0x2b8] sm:$0xff]  ;;  %v589_v49 = vld [vmem:[#allocation11 + $0x388] sm:$0xff] }
  0xba   :  { %639 = vmatpush.msra.mxu3 %v520_v52  ;;  %619 = vmatpush.msra.mxu2 %v488_v53  ;;  %v489_v50 = vld [vmem:[#allocation11 + $0x68] sm:$0xff]  ;;  %v515_v51 = vld [vmem:[#allocation11 + $0x138] sm:$0xff] }
  0xbb   :  { %679 = vmatpush.msrb.mxu1 %v584_v54  ;;  %659 = vmatpush.msrb.mxu0 %v552_v55  ;;  %v561_v52 = vld [vmem:[#allocation11 + $0x2a8] sm:$0xff]  ;;  %v587_v53 = vld [vmem:[#allocation11 + $0x378] sm:$0xff] }
  0xbc   :  { %640 = vmatpush.msra.mxu3 %v518_v56  ;;  %620 = vmatpush.msra.mxu2 %v486_v57  ;;  %v487_v54 = vld [vmem:[#allocation11 + $0x58] sm:$0xff]  ;;  %v513_v55 = vld [vmem:[#allocation11 + $0x128] sm:$0xff] }
  0xbd   :  { %680 = vmatpush.msrb.mxu1 %v582_v58  ;;  %660 = vmatpush.msrb.mxu0 %v550_v59  ;;  %v559_v56 = vld [vmem:[#allocation11 + $0x298] sm:$0xff]  ;;  %v585_v57 = vld [vmem:[#allocation11 + $0x368] sm:$0xff] }
  0xbe   :  { %641 = vmatpush.msra.mxu3 %v516_v60  ;;  %621 = vmatpush.msra.mxu2 %v484_v61  ;;  %v485_v58 = vld [vmem:[#allocation11 + $0x48] sm:$0xff]  ;;  %v511_v59 = vld [vmem:[#allocation11 + $0x118] sm:$0xff] }
  0xbf   :  { %681 = vmatpush.msrb.mxu1 %v580_v62  ;;  %661 = vmatpush.msrb.mxu0 %v548_v63  ;;  %v557_v60 = vld [vmem:[#allocation11 + $0x288] sm:$0xff]  ;;  %v583_v61 = vld [vmem:[#allocation11 + $0x358] sm:$0xff] }
  0xc0   :  { %642 = vmatpush.msra.mxu3 %v514_v0  ;;  %622 = vmatpush.msra.mxu2 %v482_v1  ;;  %v483_v62 = vld [vmem:[#allocation11 + $0x38] sm:$0xff]  ;;  %v509_v63 = vld [vmem:[#allocation11 + $0x108] sm:$0xff] }
  0xc1   :  { %682 = vmatpush.msrb.mxu1 %v578_v2  ;;  %662 = vmatpush.msrb.mxu0 %v546_v3  ;;  %v555_v0 = vld [vmem:[#allocation11 + $0x278] sm:$0xff]  ;;  %v581_v1 = vld [vmem:[#allocation11 + $0x348] sm:$0xff] }
  0xc2   :  { %643 = vmatpush.msra.mxu3 %v512_v4  ;;  %623 = vmatpush.msra.mxu2 %v480_v5  ;;  %v481_v2 = vld [vmem:[#allocation11 + $0x28] sm:$0xff]  ;;  %v579_v4 = vld [vmem:[#allocation11 + $0x338] sm:$0xff] }
  0xc3   :  { %683 = vmatpush.msrb.mxu1 %v576_v6  ;;  %663 = vmatpush.msrb.mxu0 %v544_v7  ;;  %v553_v3 = vld [vmem:[#allocation11 + $0x268] sm:$0xff]  ;;  %v479_v5 = vld [vmem:[#allocation11 + $0x18] sm:$0xff] }
  0xc4   :  { %644 = vmatpush.msra.mxu3 %v510_v8  ;;  %624 = vmatpush.msra.mxu2 %v478_v9  ;;  %v551_v6 = vld [vmem:[#allocation11 + $0x258] sm:$0xff]  ;;  %v577_v7 = vld [vmem:[#allocation11 + $0x328] sm:$0xff] }
  0xc5   :  { %684 = vmatpush.msrb.mxu1 %v574_v10  ;;  %664 = vmatpush.msrb.mxu0 %v542_v11  ;;  %v477_v8 = vld [vmem:[#allocation11 + $0x8] sm:$0xff]  ;;  %v575_v10 = vld [vmem:[#allocation11 + $0x318] sm:$0xff] }
  0xc6   :  { %645 = vmatpush.msra.mxu3 %v508_v12  ;;  %625 = vmatpush.msra.mxu2 %v476_v13  ;;  %v549_v9 = vld [vmem:[#allocation11 + $0x248] sm:$0xff]  ;;  %v547_v11 = vld [vmem:[#allocation11 + $0x238] sm:$0xff] }
  0xc7   :  { %685 = vmatpush.msrb.mxu1 %v572_v16  ;;  %665 = vmatpush.msrb.mxu0 %v540_v17  ;;  %v573_v12 = vld [vmem:[#allocation11 + $0x308] sm:$0xff] }
  0xc8   :  { %710 = vmatpush.msrb.mxu3 %v539_v14  ;;  %690 = vmatpush.msrb.mxu2 %v507_v15  ;;  %v545_v13 = vld [vmem:[#allocation11 + $0x228] sm:$0xff]  ;;  %v543_v14 = vld [vmem:[#allocation11 + $0x218] sm:$0xff] }
  0xc9   :  { %750 = vmatpush.msra.mxu1 %v603_v20  ;;  %730 = vmatpush.msra.mxu0 %v571_v21  ;;  %v302_v15 = vld [vmem:[#allocation10] sm:$0xf]  ;;  %v541_v16 = vld [vmem:[#allocation11 + $0x208] sm:$0xff] }
  0xca   :  { %711 = vmatpush.msrb.mxu3 %v537_v18  ;;  %691 = vmatpush.msrb.mxu2 %v505_v19  ;;  %v305_v17 = vperm.slane %v302_v15, 1  ;;  %v304_v21 = vperm.slane %v302_v15, 0 }
  0xcb   :  { %751 = vmatpush.msra.mxu1 %v601_v24  ;;  %731 = vmatpush.msra.mxu0 %v569_v36 }
  0xcc   :  { %712 = vmatpush.msrb.mxu3 %v535_v22  ;;  %692 = vmatpush.msrb.mxu2 %v503_v23 }
  0xcd   :  { %752 = vmatpush.msra.mxu1 %v599_v27  ;;  %732 = vmatpush.msra.mxu0 %v567_v40 }
  0xce   :  { %713 = vmatpush.msrb.mxu3 %v533_v25  ;;  %693 = vmatpush.msrb.mxu2 %v501_v26  ;;  %v307_v26 = vperm.slane %v302_v15, 3 }
  0xcf   :  { %753 = vmatpush.msra.mxu1 %v597_v30  ;;  %733 = vmatpush.msra.mxu0 %v565_v44 }
  0xd0   :  { %714 = vmatpush.msrb.mxu3 %v531_v28  ;;  %694 = vmatpush.msrb.mxu2 %v499_v29 }
  0xd1   :  { %754 = vmatpush.msra.mxu1 %v595_v37  ;;  %734 = vmatpush.msra.mxu0 %v563_v48 }
  0xd2   :  { %715 = vmatpush.msrb.mxu3 %v529_v31  ;;  %695 = vmatpush.msrb.mxu2 %v497_v34 }
  0xd3   :  { %755 = vmatpush.msra.mxu1 %v593_v41  ;;  %735 = vmatpush.msra.mxu0 %v561_v52  ;;  %v604_v41 = vld [vmem:[%s1127_s6] sm:$0x3]  ;;  %s1044_s6 = smov [#allocation13]  }
  0xd4   :  { %716 = vmatpush.msrb.mxu3 %v527_v32  ;;  %696 = vmatpush.msrb.mxu2 %v495_v38  ;;  %s820_s8 = sshll.u32 %s1044_s6, 4  ;;  %s821_s8 = int_to_ptr.vmem [resolvable:$true] %s820_s8 }
  0xd5   :  { %756 = vmatpush.msra.mxu1 %v591_v45  ;;  %736 = vmatpush.msra.mxu0 %v559_v56 }
  0xd6   :  { %717 = vmatpush.msrb.mxu3 %v525_v33  ;;  %697 = vmatpush.msrb.mxu2 %v493_v42  ;;  %v306_v33 = vperm.slane %v302_v15, 2  ;;  %v606_v42 = vperm.slane %v604_v41, 0 }
  0xd7   :  { %757 = vmatpush.msra.mxu1 %v589_v49  ;;  %737 = vmatpush.msra.mxu0 %v557_v60 }
  0xd8   :  { %718 = vmatpush.msrb.mxu3 %v523_v35  ;;  %698 = vmatpush.msrb.mxu2 %v491_v46 }
  0xd9   :  { %758 = vmatpush.msra.mxu1 %v587_v53  ;;  %738 = vmatpush.msra.mxu0 %v555_v0 }
  0xda   :  { %719 = vmatpush.msrb.mxu3 %v521_v39  ;;  %699 = vmatpush.msrb.mxu2 %v489_v50  ;;  %v607_v50 = vperm.slane %v604_v41, 1 }
  0xdb   :  { %759 = vmatpush.msra.mxu1 %v585_v57  ;;  %739 = vmatpush.msra.mxu0 %v553_v3 }
  0xdc   :  { %720 = vmatpush.msrb.mxu3 %v519_v43  ;;  %700 = vmatpush.msrb.mxu2 %v487_v54 }
  0xdd   :  { %760 = vmatpush.msra.mxu1 %v583_v61  ;;  %740 = vmatpush.msra.mxu0 %v551_v6 }
  0xde   :  { %721 = vmatpush.msrb.mxu3 %v517_v47  ;;  %701 = vmatpush.msrb.mxu2 %v485_v58 }
  0xdf   :  { %761 = vmatpush.msra.mxu1 %v581_v1  ;;  %741 = vmatpush.msra.mxu0 %v549_v9 }
  0xe0   :  { %722 = vmatpush.msrb.mxu3 %v515_v51  ;;  %702 = vmatpush.msrb.mxu2 %v483_v62 }
  0xe1   :  { %762 = vmatpush.msra.mxu1 %v579_v4  ;;  %742 = vmatpush.msra.mxu0 %v547_v11 }
  0xe2   :  { %723 = vmatpush.msrb.mxu3 %v513_v55  ;;  %703 = vmatpush.msrb.mxu2 %v481_v2 }
  0xe3   :  { %763 = vmatpush.msra.mxu1 %v577_v7  ;;  %743 = vmatpush.msra.mxu0 %v545_v13 }
  0xe4   :  { %724 = vmatpush.msrb.mxu3 %v511_v59  ;;  %704 = vmatpush.msrb.mxu2 %v479_v5 }
  0xe5   :  { %764 = vmatpush.msra.mxu1 %v575_v10  ;;  %744 = vmatpush.msra.mxu0 %v543_v14 }
  0xe6   :  { %725 = vmatpush.msrb.mxu3 %v509_v63  ;;  %705 = vmatpush.msrb.mxu2 %v477_v8 }
  0xe7   :  { %765 = vmatpush.msra.mxu1 %v573_v12  ;;  %745 = vmatpush.msra.mxu0 %v541_v16 }
 0x121   :  { %v369_v18 = vpop.f32.mrf.mxu0 }
 0x122   :  { %v389_v19 = vpop.f32.mrf.mxu1  ;;  %v370_v20 = vadd.f32 %v369_v18, %v305_v17 }
 0x124   :  { %v390_v22 = vadd.f32 %v389_v19, %v370_v20 }
 0x126   :  { %v473_v23 = vmax.f32 %v390_v22, 0.0 }
 0x127   :  { %v329_v24 = vpop.f32.mrf.mxu2 }
 0x128   :  { %v349_v25 = vpop.f32.mrf.mxu3  ;;  %v330_v27 = vadd.f32 %v329_v24, %v304_v21  ;;  %646 = vmatmul.f32.vlgmr.msra.gmra.mxu3 %v473_v23 }
 0x129   :  { %v449_v29 = vpop.f32.mrf.mxu0 }
 0x12a   :  { %v350_v28 = vadd.f32 %v349_v25, %v330_v27  ;;  %v450_v30 = vadd.f32 %v449_v29, %v307_v26  ;;  %v469_v32 = vpop.f32.mrf.mxu1 }
 0x12c   :  { %v472_v31 = vmax.f32 %v350_v28, 0.0  ;;  %v470_v34 = vadd.f32 %v469_v32, %v450_v30 }
 0x12e   :  { %626 = vmatmul.f32.vlgmr.msra.gmra.mxu2 %v472_v31  ;;  %v475_v35 = vmax.f32 %v470_v34, 0.0 }
 0x12f   :  { %v409_v36 = vpop.f32.mrf.mxu2 }
 0x130   :  { %v410_v37 = vadd.f32 %v409_v36, %v306_v33  ;;  %v429_v38 = vpop.f32.mrf.mxu3  ;;  %686 = vmatmul.f32.vlgmr.msrb.gmra.mxu1 %v475_v35  ;;  %726 = vmatmul.f32.vlgmr.msrb.gmra.mxu3 %v473_v23 }
 0x132   :  { %v430_v39 = vadd.f32 %v429_v38, %v410_v37 }
 0x134   :  { %v474_v40 = vmax.f32 %v430_v39, 0.0 }
 0x136   :  { %666 = vmatmul.f32.vlgmr.msrb.gmra.mxu0 %v474_v40  ;;  %706 = vmatmul.f32.vlgmr.msrb.gmra.mxu2 %v472_v31 }
 0x138   :  { %766 = vmatmul.f32.vlgmr.msra.gmra.mxu1 %v475_v35 }
 0x13e   :  { %746 = vmatmul.f32.vlgmr.msra.gmra.mxu0 %v474_v40 }
 0x1ab   :  { %v647_v43 = vpop.f32.mrf.mxu3 }
 0x1ad   :  { %v687_v48 = vpop.f32.mrf.mxu1 }
 0x1b1   :  { %v627_v44 = vpop.f32.mrf.mxu2 }
 0x1b2   :  { %v628_v45 = vadd.f32 %v627_v44, %v606_v42 }
 0x1b3   :  { %v667_v46 = vpop.f32.mrf.mxu0  ;;  %v727_v55 = vpop.f32.mrf.mxu3 }
 0x1b4   :  { %v648_v47 = vadd.f32 %v647_v43, %v628_v45 }
 0x1b5   :  { %v767_v60 = vpop.f32.mrf.mxu1 }
 0x1b6   :  { %v668_v49 = vadd.f32 %v667_v46, %v648_v47 }
 0x1b8   :  { %v688_v51 = vadd.f32 %v687_v48, %v668_v49 }
 0x1b9   :  { %v707_v52 = vpop.f32.mrf.mxu2 }
 0x1ba   :  { %v770_v53 = vsub.f32 0.0, %v688_v51  ;;  %v708_v54 = vadd.f32 %v707_v52, %v607_v50 }
 0x1bb   :  { %v747_v58 = vpop.f32.mrf.mxu0 }
 0x1bc   :  { %v772_v56 = vmul.f32 1.442695, %v770_v53  ;;  %v728_v57 = vadd.f32 %v727_v55, %v708_v54 }
 0x1be   :  { %848 = vpow2.f32 %v772_v56  ;;  %v748_v59 = vadd.f32 %v747_v58, %v728_v57 }
 0x1c0   :  { %v768_v61 = vadd.f32 %v767_v60, %v748_v59 }
 0x1c2   :  { %v771_v62 = vsub.f32 0.0, %v768_v61 }
 0x1c4   :  { %v849_v63 = vpop.eup %848  ;;  %v774_v0 = vmul.f32 1.442695, %v771_v62 }
 0x1c5   :  { %v776_v1 = vadd.f32 1.0, %v849_v63 }
 0x1c6   :  { %850 = vpow2.f32 %v774_v0 }
 0x1c7   :  { %852 = vrcp.f32 %v776_v1  ;;  %vm783_vm3 = vweird.f32 %v776_v1  ;;  %v789_v15 = vand.u32 2147483648, %v776_v1  ;;  %v787_v17 = vand.u32 2147483647, %v776_v1 }
 0x1c9   :  { %v790_v22 = vor.u32 1.1754944e-38, %v789_v15  ;;  %vm788_vm9 = vcmp.eq.f32.partialorder %v787_v17, 8.507059e+37 }
 0x1cc   :  { %v851_v2 = vpop.eup %850 }
 0x1cd   :  { %v853_v3 = vpop.eup %852  ;;  %v777_v4 = vadd.f32 1.0, %v851_v2 }
 0x1ce   :  { %v779_v5 = vmul.f32 %v853_v3, %v776_v1  ;;  %vm784_vm1 = vweird.f32 %v853_v3 }
 0x1cf   :  { %854 = vrcp.f32 %v777_v4  ;;  %v804_v11 = vand.u32 2147483648, %v777_v4  ;;  %v802_v14 = vand.u32 2147483647, %v777_v4  ;;  %vm1112_vm4 = vmor %vm783_vm3, %vm784_vm1  ;;  %vm798_vm5 = vweird.f32 %v777_v4 }
 0x1d0   :  { %v780_v6 = vsub.f32 1.0, %v779_v5 }
 0x1d1   :  { %v805_v19 = vor.u32 1.1754944e-38, %v804_v11  ;;  %vm803_vm7 = vcmp.eq.f32.partialorder %v802_v14, 8.507059e+37 }
 0x1d2   :  { %v781_v9 = vmul.f32 %v853_v3, %v780_v6 }
 0x1d4   :  { %v782_v12 = vadd.f32 %v853_v3, %v781_v9 }
 0x1d5   :  { %v855_v7 = vpop.eup %854 }
 0x1d6   :  { %v794_v8 = vmul.f32 %v855_v7, %v777_v4  ;;  %vm799_vm2 = vweird.f32 %v855_v7  ;;  %v786_v20 = vsel %vm1112_vm4, %v853_v3, %v782_v12 }
 0x1d7   :  { %vm800_vm6 = vmor %vm798_vm5, %vm799_vm2  ;;  %v791_v25 = vsel %vm788_vm9, %v790_v22, %v786_v20 }
 0x1d8   :  { %v795_v10 = vsub.f32 1.0, %v794_v8 }
 0x1da   :  { %v796_v13 = vmul.f32 %v855_v7, %v795_v10 }
 0x1dc   :  { %v797_v18 = vadd.f32 %v855_v7, %v796_v13 }
 0x1de   :  { %v801_v21 = vsel %vm800_vm6, %v855_v7, %v797_v18 }
 0x1df   :  { %v806_v23 = vsel %vm803_vm7, %v805_v19, %v801_v21 }
 0x1e0   :  { %v810_v24 = vrot.slane %v806_v23, 6 }
 0x1e2   :  { %v812_v26 = vsel %vm811_vm8, %v791_v25, %v810_v24 }
 0x1e3   :  { %814 = vst [vmem:[#allocation13] sm:$0xf] %v812_v26 }
 0x1e4   :  { %825 = dma.vmem_to_hbm [thread:$0]  %s821_s8, 64, %s823_s11, [#allocation4]  }
 0x1e5   :  { %1032 = dma.done.wait [#allocation4], 64  }
 0x1e6   :  { %1033 = vsyncadd [#allocation4], 4294967232 }
 0x1e7   :  { %830 = vsyncpa [#allocation3], 1 }
 0x1e8   :  { %831 = vsyncpa [#allocation6], 1 }
 0x1e9   :  { %832 = vsyncpa [#allocation9], 1 }
 0x1ea   :  { %833 = vsyncpa [#allocation12], 1 }
 0x1eb   :  { %834 = vsyncpa [#allocation4], 1 }

</bundles_post_ra>
